<compile_context>
chip_gen: v6e
topology: v6e:2x2x1
jax: 0.10.0
libtpu: 0.0.40
codegen_flags: <defaults>
</compile_context>

<pallas_src>
import functools

import jax
import jax.numpy as jnp
from jax.experimental import pallas as pl
from jax.experimental.pallas import tpu as pltpu


def _softmax_last(logits, mask=None):
    """Softmax over the last (lane) axis of an (Nb, L) f32 tensor; optional mult. mask."""
    logits = logits - jnp.max(logits, axis=-1, keepdims=True)
    e = jnp.exp(logits)
    if mask is not None:
        e = e * mask
    # NOTE: matches the PyTorch masksoftmax — a fully-masked row yields NaN (0 * inf).
    return e * pl.reciprocal(jnp.sum(e, axis=-1, keepdims=True), approx=True)


def _pool(a, feats):
    """Weighted pool sum_l a[n, l] * feats[n, l, :] as a batched MXU matvec -> (Nb, D) f32."""
    return jnp.einsum(
        "nql,nld->nqd", a[:, None, :].astype(feats.dtype), feats,
        preferred_element_type=jnp.float32,
    )[:, 0, :]


def alternating_attention_kernel(
    ques_ref, img_ref, mask_ref,
    wq_ref, bq_ref,            # fused dense_h1 | dense_h3_1 : (Dq, 2E), (1, 2E)
    wa1_ref,                   # dense_a1 weight as (1, E)   (bias dropped: softmax shift-invariant)
    wh21_ref, bh21_ref,        # dense_h2_1 : (Di, E), (1, E)
    wh22_ref, bh22_ref,        # dense_h2_2 : (Dq, E), (1, E)
    wa2_ref,                   # dense_a2 weight as (1, E)
    wh32_ref, bh32_ref,        # dense_h3_2 : (Di, E), (1, E)
    wa3_ref,                   # dense_a3 weight as (1, E)
    out_ref,                   # (Nb, Dq + Di)  ->  [s3 | v2]
    *, lq_valid, li_valid,
):
    f32 = jnp.float32
    ques = ques_ref[...]           # (Nb, Lq, Dq)  compute dtype (bf16 on the fast path)
    img = img_ref[...]             # (Nb, Li, Di)  compute dtype
    mask = mask_ref[...]           # (Nb, Lq) f32, lane-dense (includes Lq padding zeros)

    Nb, Lq, Dq = ques.shape
    _, Li, Di = img.shape
    E = wa1_ref.shape[-1]
    cdt = ques.dtype               # MXU operand dtype

    # Layout-preserving merges: Lq / Li were padded to multiples of 8 in the wrapper.
    q2d = ques.reshape(Nb * Lq, Dq)
    i2d = img.reshape(Nb * Li, Di)

    # ---- fused question projection: one MXU matmul feeds stage 1 (h1) and stage 3 (h3_1) ----
    hq = jnp.dot(q2d, wq_ref[...], preferred_element_type=f32) + bq_ref[...]   # (Nb*Lq, 2E) f32
    h1 = jnp.tanh(hq[:, :E]).reshape(Nb, Lq, E)                                # f32 elementwise
    h31 = hq[:, E:].astype(cdt)    # long-lived pre-tanh value; bf16 storage halves its bytes
    # TODO(synk): nn.Dropout(0.5) is stochastic; treated as identity (inference/eval mode).

    # ---- stage 1: masked question self-attention (softmax over lane axis) ----
    l1 = jnp.sum(h1 * wa1_ref[...][None], axis=-1)      # (Nb, Lq) f32 logits (VPU lane reduce)
    a1 = _softmax_last(l1, mask)                        # padded Lq positions masked via mask
    s1 = _pool(a1, ques)                                # (Nb, Dq) f32, MXU pool

    # ---- stage 2: image attention guided by s1 ----
    h2 = jnp.dot(i2d, wh21_ref[...], preferred_element_type=f32) + bh21_ref[...]         # (Nb*Li, E)
    g2 = jnp.dot(s1.astype(cdt), wh22_ref[...], preferred_element_type=f32) + bh22_ref[...]  # (Nb, E)
    h2 = jnp.tanh(h2.reshape(Nb, Li, E) + g2[:, None, :])                                # f32
    l2 = jnp.sum(h2 * wa2_ref[...][None], axis=-1)      # (Nb, Li)
    if li_valid != Li:               # static: only emitted when Li was padded
        li_mask = (jax.lax.broadcasted_iota(jnp.int32, (Nb, Li), 1) < li_valid).astype(f32)
        a2 = _softmax_last(l2, li_mask)
    else:
        a2 = _softmax_last(l2)
    v2 = _pool(a2, img)                                 # (Nb, Di)

    # ---- stage 3: question attention guided by v2 ----
    g3 = jnp.dot(v2.astype(cdt), wh32_ref[...], preferred_element_type=f32) + bh32_ref[...]   # (Nb, E)
    h3 = jnp.tanh(h31.astype(f32).reshape(Nb, Lq, E) + g3[:, None, :])
    l3 = jnp.sum(h3 * wa3_ref[...][None], axis=-1)      # (Nb, Lq)
    if lq_valid != Lq:               # static: only emitted when Lq was padded
        lq_mask = (jax.lax.broadcasted_iota(jnp.int32, (Nb, Lq), 1) < lq_valid).astype(f32)
        a3 = _softmax_last(l3, lq_mask)
    else:
        a3 = _softmax_last(l3)
    s3 = _pool(a3, ques)                                # (Nb, Dq)

    # Two direct stores instead of a concatenated slab (no extra VPU copy before vst).
    out_ref[:, :Dq] = s3.astype(out_ref.dtype)
    out_ref[:, Dq:] = v2.astype(out_ref.dtype)


def _chip_tuning():
    """(vmem_limit_bytes, min_grid_steps) per TPU generation."""
    try:
        kind = jax.devices()[0].device_kind.lower()
    except Exception:
        kind = ""
    if "v7" in kind:
        return 48 * 1024 * 1024, 2      # 64 MiB physical VMEM; want >=2 steps for the 2 TCs
    if "v5" in kind or "v6" in kind:
        return 100 * 1024 * 1024, 1     # 128 MiB physical VMEM
    return 64 * 1024 * 1024, 1


def _pick_batch_block(N, Lq, Li, Dq, Di, E, budget, min_grid_steps):
    """Largest batch block that tiles N exactly, keeps the mask/out sublane dim aligned
    (multiple of 8 or == N), fits the per-chip VMEM budget, and feeds M >= 256 rows
    (batch_block * L) into the MXU when possible."""
    # Rough per-batch-element VMEM footprint: 2x-buffered bf16 ques/img blocks,
    # f32 matmul/tanh intermediates (hq, h2, h3), 2x-buffered f32 output slab.
    per_b = (2 * 2 * (Lq * Dq + Li * Di)
             + 4 * (2 * Lq * E + Li * E + Lq * E)
             + 2 * 4 * (Dq + Di))
    # Resident weights (constant index maps are DMA'd once but still double-buffered).
    resident = 2 * (2 * (Dq * 2 * E + 2 * Di * E + Dq * E) + 4 * 8 * E)
    avail = (budget * 3) // 4 - resident
    cap = max(1, avail // per_b) if avail > 0 else 1
    want = max(8, -(-256 // max(1, min(Lq, Li))))       # target M = batch_block * L >= 256

    cand = [b for b in range(8, N + 1, 8)
            if N % b == 0 and b <= cap and N // b >= min_grid_steps]
    if not cand:
        cand = [b for b in range(8, N + 1, 8) if N % b == 0 and b <= cap]
    if cand:
        ge = [b for b in cand if b >= want]
        return min(ge) if ge else max(cand)
    return N                                            # small / unaligned batch: one block


def alternating_attention(ques_feat, img_feat, mask, params, *,
                          batch_block=None, compute_dtype=jnp.bfloat16):
    (w_h1, b_h1, w_a1, _b_a1,
     w_h21, b_h21, w_h22, b_h22, w_a2, _b_a2,
     w_h31, b_h31, w_h32, b_h32, w_a3, _b_a3) = params

    N, Lq, Dq = ques_feat.shape
    _, Li, Di = img_feat.shape
    E = w_h1.shape[1]
    f32 = jnp.float32

    # Pad Lq / Li to multiples of 8 (sublane tile) so in-kernel reshapes are views.
    Lq_p = -(-Lq // 8) * 8
    Li_p = -(-Li // 8) * 8
    mask2 = mask.astype(f32).reshape(N, Lq)             # lane-dense stage-1 mask
    if Lq_p != Lq:
        ques_feat = jnp.pad(ques_feat, ((0, 0), (0, Lq_p - Lq), (0, 0)))
        mask2 = jnp.pad(mask2, ((0, 0), (0, Lq_p - Lq)))   # pad rows masked in stage 1
    if Li_p != Li:
        img_feat = jnp.pad(img_feat, ((0, 0), (0, Li_p - Li), (0, 0)))

    # bf16 MXU operands (f32 accumulation inside the kernel); biases / 1-unit heads stay f32.
    ques_in = ques_feat.astype(compute_dtype)
    img_in = img_feat.astype(compute_dtype)
    wq = jnp.concatenate([w_h1, w_h31], axis=1).astype(compute_dtype)   # fused (Dq, 2E)
    bq = jnp.concatenate([b_h1, b_h31], axis=1).astype(f32)             # (1, 2E)
    wh21 = w_h21.astype(compute_dtype)
    wh22 = w_h22.astype(compute_dtype)
    wh32 = w_h32.astype(compute_dtype)

    vmem_budget, min_grid_steps = _chip_tuning()
    if batch_block is None:
        batch_block = _pick_batch_block(N, Lq_p, Li_p, Dq, Di, E, vmem_budget, min_grid_steps)
    grid = (N // batch_block,)

    def full(a):
        # NOTE(v7x): constant-index-map weight blocks are DMA'd once but still get a
        # double-buffered VMEM allocation; pl.Buffered(1) pipeline_mode could halve that
        # if weights become VMEM-limiting at production sizes.
        return pl.BlockSpec(a.shape, lambda b, _nd=a.ndim: (0,) * _nd)

    in_specs = [
        pl.BlockSpec((batch_block, Lq_p, Dq), lambda b: (b, 0, 0)),   # ques
        pl.BlockSpec((batch_block, Li_p, Di), lambda b: (b, 0, 0)),   # img
        pl.BlockSpec((batch_block, Lq_p), lambda b: (b, 0)),          # mask
        full(wq), full(bq), full(w_a1),
        full(wh21), full(b_h21), full(wh22), full(b_h22), full(w_a2),
        full(wh32), full(b_h32), full(w_a3),
    ]
    out_spec = pl.BlockSpec((batch_block, Dq + Di), lambda b: (b, 0))

    kernel = functools.partial(alternating_attention_kernel, lq_valid=Lq, li_valid=Li)

    out = pl.pallas_call(
        kernel,
        out_shape=jax.ShapeDtypeStruct((N, Dq + Di), f32),
        grid_spec=pltpu.PrefetchScalarGridSpec(
            num_scalar_prefetch=0,
            grid=grid,
            in_specs=in_specs,
            out_specs=out_spec,
        ),
        compiler_params=pltpu.CompilerParams(
            dimension_semantics=("parallel",),          # batch axis -> megacore / v7x 2-TC
            vmem_limit_bytes=vmem_budget,
        ),
    )(ques_in, img_in, mask2, wq, bq, w_a1,
      wh21, b_h21, wh22, b_h22, w_a2,
      wh32, b_h32, w_a3)

    return out[:, :Dq], out[:, Dq:]


def init_params(key, input_ques_dim, input_img_dim, embedding_dim):
    """Deterministic Linear params. 'h' weights are (in, out); 'a' weights are (1, E)."""
    Dq, Di, E = input_ques_dim, input_img_dim, embedding_dim
    layer_dims = [
        (Dq, E),  # dense_h1
        (E, 1),   # dense_a1
        (Di, E),  # dense_h2_1
        (Dq, E),  # dense_h2_2
        (E, 1),   # dense_a2
        (Dq, E),  # dense_h3_1
        (Di, E),  # dense_h3_2
        (E, 1),   # dense_a3
    ]
    keys = jax.random.split(key, 2 * len(layer_dims))
    params = []
    for i, (din, dout) in enumerate(layer_dims):
        bound = 1.0 / (din ** 0.5)
        if dout == 1:
            # attention projection stored as (1, E) for in-kernel lane reduction
            w = jax.random.uniform(keys[2 * i], (1, din), jnp.float32, -bound, bound)
            b = jax.random.uniform(keys[2 * i + 1], (1, 1), jnp.float32, -bound, bound)
        else:
            w = jax.random.uniform(keys[2 * i], (din, dout), jnp.float32, -bound, bound)
            b = jax.random.uniform(keys[2 * i + 1], (1, dout), jnp.float32, -bound, bound)
        params += [w, b]
    return params


def reference(ques, img, mask, params):
    """Plain-JAX f32 reference of the PyTorch forward (dropout = identity)."""
    (w_h1, b_h1, w_a1, b_a1, w_h21, b_h21, w_h22, b_h22,
     w_a2, b_a2, w_h31, b_h31, w_h32, b_h32, w_a3, b_a3) = params

    h1 = jnp.tanh(ques @ w_h1 + b_h1)
    a1 = jnp.sum(h1 * w_a1[None], axis=-1) + b_a1[0, 0]          # (N, Lq)
    a1 = a1 - a1.max(axis=1, keepdims=True)
    e1 = jnp.exp(a1) * mask
    a1 = e1 / e1.sum(axis=1, keepdims=True)
    s1 = (a1[..., None] * ques).sum(axis=1)

    h2 = jnp.tanh(img @ w_h21 + b_h21 + (s1 @ w_h22 + b_h22)[:, None, :])
    a2 = jax.nn.softmax(jnp.sum(h2 * w_a2[None], axis=-1) + b_a2[0, 0], axis=1)
    v2 = (a2[..., None] * img).sum(axis=1)

    h3 = jnp.tanh(ques @ w_h31 + b_h31 + (v2 @ w_h32 + b_h32)[:, None, :])
    a3 = jax.nn.softmax(jnp.sum(h3 * w_a3[None], axis=-1) + b_a3[0, 0], axis=1)
    s3 = (a3[..., None] * ques).sum(axis=1)
    return s3, v2


if __name__ == "__main__":
    # Small shapes consistent with the module's forward.
    N, Lq, Li = 2, 8, 8
    input_ques_dim, input_img_dim, embedding_dim = 32, 32, 32

    key = jax.random.PRNGKey(0)
    k_q, k_i, k_p = jax.random.split(key, 3)
    ques_feat = jax.random.normal(k_q, (N, Lq, input_ques_dim), jnp.float32)
    img_feat = jax.random.normal(k_i, (N, Li, input_img_dim), jnp.float32)
    # mask out the last two question positions of batch element 0
    mask = jnp.ones((N, Lq), jnp.float32).at[0, -2:].set(0.0)
    params = init_params(k_p, input_ques_dim, input_img_dim, embedding_dim)

    s3_ref, v2_ref = reference(ques_feat, img_feat, mask, params)

    # Exact-semantics check (f32 MXU operands).
    s3f, v2f = jax.block_until_ready(
        alternating_attention(ques_feat, img_feat, mask, params, compute_dtype=jnp.float32))
    assert s3f.shape == (N, input_ques_dim) and v2f.shape == (N, input_img_dim)
    assert jnp.allclose(s3f, s3_ref, atol=2e-2, rtol=2e-2)
    assert jnp.allclose(v2f, v2_ref, atol=2e-2, rtol=2e-2)

    # Fast path (bf16 MXU operands, f32 accumulation) — relaxed tolerance vs f32 reference.
    s3, v2 = jax.block_until_ready(
        alternating_attention(ques_feat, img_feat, mask, params))
    assert s3.shape == (N, input_ques_dim) and v2.shape == (N, input_img_dim)
    assert jnp.allclose(s3, s3_ref, atol=5e-2, rtol=5e-2)
    assert jnp.allclose(v2, v2_ref, atol=5e-2, rtol=5e-2)

    print("KERNEL_OK")
</pallas_src>

<mosaic_0001>
module attributes {stable_mosaic.version = 11 : i64} {
  func.func @alternating_attention_kernel(%arg0: i32, %arg1: memref<2x8x32xf32, #tpu.memory_space<vmem>>, %arg2: memref<2x8x32xf32, #tpu.memory_space<vmem>>, %arg3: memref<2x8xf32, #tpu.memory_space<vmem>>, %arg4: memref<32x64xf32, #tpu.memory_space<vmem>>, %arg5: memref<1x64xf32, #tpu.memory_space<vmem>>, %arg6: memref<1x32xf32, #tpu.memory_space<vmem>>, %arg7: memref<32x32xf32, #tpu.memory_space<vmem>>, %arg8: memref<1x32xf32, #tpu.memory_space<vmem>>, %arg9: memref<32x32xf32, #tpu.memory_space<vmem>>, %arg10: memref<1x32xf32, #tpu.memory_space<vmem>>, %arg11: memref<1x32xf32, #tpu.memory_space<vmem>>, %arg12: memref<32x32xf32, #tpu.memory_space<vmem>>, %arg13: memref<1x32xf32, #tpu.memory_space<vmem>>, %arg14: memref<1x32xf32, #tpu.memory_space<vmem>>, %arg15: memref<2x64xf32, #tpu.memory_space<vmem>>) attributes {dimension_semantics = [#tpu.dimension_semantics<parallel>], iteration_bounds = array<i64: 1>, scalar_prefetch = 0 : i64, scratch_operands = 0 : i64, tpu.core_type = #tpu.core_type<tc>, window_params = [{transform_indices = @transform_0, window_bounds = array<i64: 2, 8, 32>}, {transform_indices = @transform_1, window_bounds = array<i64: 2, 8, 32>}, {transform_indices = @transform_2, window_bounds = array<i64: 2, 8>}, {pipeline_mode = #tpu.pipeline_mode<synchronous>, transform_indices = @transform_3, window_bounds = array<i64: 32, 64>}, {pipeline_mode = #tpu.pipeline_mode<synchronous>, transform_indices = @transform_4, window_bounds = array<i64: 1, 64>}, {pipeline_mode = #tpu.pipeline_mode<synchronous>, transform_indices = @transform_5, window_bounds = array<i64: 1, 32>}, {pipeline_mode = #tpu.pipeline_mode<synchronous>, transform_indices = @transform_6, window_bounds = array<i64: 32, 32>}, {pipeline_mode = #tpu.pipeline_mode<synchronous>, transform_indices = @transform_7, window_bounds = array<i64: 1, 32>}, {pipeline_mode = #tpu.pipeline_mode<synchronous>, transform_indices = @transform_8, window_bounds = array<i64: 32, 32>}, {pipeline_mode = #tpu.pipeline_mode<synchronous>, transform_indices = @transform_9, window_bounds = array<i64: 1, 32>}, {pipeline_mode = #tpu.pipeline_mode<synchronous>, transform_indices = @transform_10, window_bounds = array<i64: 1, 32>}, {pipeline_mode = #tpu.pipeline_mode<synchronous>, transform_indices = @transform_11, window_bounds = array<i64: 32, 32>}, {pipeline_mode = #tpu.pipeline_mode<synchronous>, transform_indices = @transform_12, window_bounds = array<i64: 1, 32>}, {pipeline_mode = #tpu.pipeline_mode<synchronous>, transform_indices = @transform_13, window_bounds = array<i64: 1, 32>}, {transform_indices = @transform_14, window_bounds = array<i64: 2, 64>}]} {
    %c0 = arith.constant 0 : index
    %c0_0 = arith.constant 0 : index
    %c0_1 = arith.constant 0 : index
    %0 = vector.load %arg1[%c0, %c0_0, %c0_1] : memref<2x8x32xf32, #tpu.memory_space<vmem>>, vector<2x8x32xf32>
    %c0_2 = arith.constant 0 : index
    %c0_3 = arith.constant 0 : index
    %c0_4 = arith.constant 0 : index
    %1 = vector.load %arg2[%c0_2, %c0_3, %c0_4] : memref<2x8x32xf32, #tpu.memory_space<vmem>>, vector<2x8x32xf32>
    %c0_5 = arith.constant 0 : index
    %c0_6 = arith.constant 0 : index
    %2 = vector.load %arg3[%c0_5, %c0_6] : memref<2x8xf32, #tpu.memory_space<vmem>>, vector<2x8xf32>
    %3 = vector.shape_cast %0 : vector<2x8x32xf32> to vector<16x32xf32>
    %4 = vector.shape_cast %1 : vector<2x8x32xf32> to vector<16x32xf32>
    %c0_7 = arith.constant 0 : index
    %c0_8 = arith.constant 0 : index
    %5 = vector.load %arg4[%c0_7, %c0_8] : memref<32x64xf32, #tpu.memory_space<vmem>>, vector<32x64xf32>
    %cst = arith.constant dense<0.000000e+00> : vector<16x64xf32>
    %6 = tpu.matmul %3, %5, %cst {dimension_numbers = #tpu.dot_dimension_numbers<[1], [0], [0], [1], [0, 0, 1, 1], [], []>} : vector<16x32xf32>, vector<32x64xf32>, vector<16x64xf32> -> vector<16x64xf32>
    %c0_9 = arith.constant 0 : index
    %c0_10 = arith.constant 0 : index
    %7 = vector.load %arg5[%c0_9, %c0_10] : memref<1x64xf32, #tpu.memory_space<vmem>>, vector<1x64xf32>
    %8 = vector.broadcast %7 : vector<1x64xf32> to vector<16x64xf32>
    %9 = arith.addf %6, %8 : vector<16x64xf32>
    %10 = vector.extract_strided_slice %9 {offsets = [0, 0], sizes = [16, 32], strides = [1, 1]} : vector<16x64xf32> to vector<16x32xf32>
    %11 = math.tanh %10 : vector<16x32xf32>
    %12 = vector.shape_cast %11 : vector<16x32xf32> to vector<2x8x32xf32>
    %13 = vector.extract_strided_slice %9 {offsets = [0, 32], sizes = [16, 32], strides = [1, 1]} : vector<16x64xf32> to vector<16x32xf32>
    %c0_11 = arith.constant 0 : index
    %c0_12 = arith.constant 0 : index
    %14 = vector.load %arg6[%c0_11, %c0_12] : memref<1x32xf32, #tpu.memory_space<vmem>>, vector<1x32xf32>
    %15 = vector.shape_cast %14 : vector<1x32xf32> to vector<1x1x32xf32>
    %16 = vector.broadcast %15 : vector<1x1x32xf32> to vector<2x8x32xf32>
    %17 = arith.mulf %12, %16 : vector<2x8x32xf32>
    %cst_13 = arith.constant dense<0.000000e+00> : vector<2x8xf32>
    %18 = vector.multi_reduction <add>, %17, %cst_13 [2] : vector<2x8x32xf32> to vector<2x8xf32>
    %cst_14 = arith.constant dense<0xFF800000> : vector<2xf32>
    %19 = vector.multi_reduction <maximumf>, %18, %cst_14 [1] : vector<2x8xf32> to vector<2xf32>
    %20 = vector.shape_cast %19 : vector<2xf32> to vector<2x1xf32>
    %21 = vector.broadcast %20 : vector<2x1xf32> to vector<2x8xf32>
    %22 = arith.subf %18, %21 : vector<2x8xf32>
    %23 = math.exp %22 : vector<2x8xf32>
    %24 = arith.mulf %23, %2 : vector<2x8xf32>
    %cst_15 = arith.constant dense<0.000000e+00> : vector<2xf32>
    %25 = vector.multi_reduction <add>, %24, %cst_15 [1] : vector<2x8xf32> to vector<2xf32>
    %26 = vector.shape_cast %25 : vector<2xf32> to vector<2x1xf32>
    %27 = tpu.reciprocal %26 {approx = true} : vector<2x1xf32> -> vector<2x1xf32>
    %28 = vector.broadcast %27 : vector<2x1xf32> to vector<2x8xf32>
    %29 = arith.mulf %24, %28 : vector<2x8xf32>
    %30 = vector.shape_cast %29 : vector<2x8xf32> to vector<2x1x8xf32>
    "tpu.trace_start"() <{level = 10 : i32, message = "nql,nld->nqd"}> : () -> ()
    %cst_16 = arith.constant dense<0.000000e+00> : vector<2x1x32xf32>
    %31 = tpu.matmul %30, %0, %cst_16 {dimension_numbers = #tpu.dot_dimension_numbers<[2], [1], [1], [2], [0, 0, 0, 1, 1, 2], [0], [0]>} : vector<2x1x8xf32>, vector<2x8x32xf32>, vector<2x1x32xf32> -> vector<2x1x32xf32>
    "tpu.trace_stop"() : () -> ()
    %32 = vector.shape_cast %31 : vector<2x1x32xf32> to vector<2x32xf32>
    %c0_17 = arith.constant 0 : index
    %c0_18 = arith.constant 0 : index
    %33 = vector.load %arg7[%c0_17, %c0_18] : memref<32x32xf32, #tpu.memory_space<vmem>>, vector<32x32xf32>
    %cst_19 = arith.constant dense<0.000000e+00> : vector<16x32xf32>
    %34 = tpu.matmul %4, %33, %cst_19 {dimension_numbers = #tpu.dot_dimension_numbers<[1], [0], [0], [1], [0, 0, 1, 1], [], []>} : vector<16x32xf32>, vector<32x32xf32>, vector<16x32xf32> -> vector<16x32xf32>
    %c0_20 = arith.constant 0 : index
    %c0_21 = arith.constant 0 : index
    %35 = vector.load %arg8[%c0_20, %c0_21] : memref<1x32xf32, #tpu.memory_space<vmem>>, vector<1x32xf32>
    %36 = vector.broadcast %35 : vector<1x32xf32> to vector<16x32xf32>
    %37 = arith.addf %34, %36 : vector<16x32xf32>
    %c0_22 = arith.constant 0 : index
    %c0_23 = arith.constant 0 : index
    %38 = vector.load %arg9[%c0_22, %c0_23] : memref<32x32xf32, #tpu.memory_space<vmem>>, vector<32x32xf32>
    %cst_24 = arith.constant dense<0.000000e+00> : vector<2x32xf32>
    %39 = tpu.matmul %32, %38, %cst_24 {dimension_numbers = #tpu.dot_dimension_numbers<[1], [0], [0], [1], [0, 0, 1, 1], [], []>} : vector<2x32xf32>, vector<32x32xf32>, vector<2x32xf32> -> vector<2x32xf32>
    %c0_25 = arith.constant 0 : index
    %c0_26 = arith.constant 0 : index
    %40 = vector.load %arg10[%c0_25, %c0_26] : memref<1x32xf32, #tpu.memory_space<vmem>>, vector<1x32xf32>
    %41 = vector.broadcast %40 : vector<1x32xf32> to vector<2x32xf32>
    %42 = arith.addf %39, %41 : vector<2x32xf32>
    %43 = vector.shape_cast %37 : vector<16x32xf32> to vector<2x8x32xf32>
    %44 = vector.shape_cast %42 : vector<2x32xf32> to vector<2x1x32xf32>
    %45 = vector.broadcast %44 : vector<2x1x32xf32> to vector<2x8x32xf32>
    %46 = arith.addf %43, %45 : vector<2x8x32xf32>
    %47 = math.tanh %46 : vector<2x8x32xf32>
    %c0_27 = arith.constant 0 : index
    %c0_28 = arith.constant 0 : index
    %48 = vector.load %arg11[%c0_27, %c0_28] : memref<1x32xf32, #tpu.memory_space<vmem>>, vector<1x32xf32>
    %49 = vector.shape_cast %48 : vector<1x32xf32> to vector<1x1x32xf32>
    %50 = vector.broadcast %49 : vector<1x1x32xf32> to vector<2x8x32xf32>
    %51 = arith.mulf %47, %50 : vector<2x8x32xf32>
    %cst_29 = arith.constant dense<0.000000e+00> : vector<2x8xf32>
    %52 = vector.multi_reduction <add>, %51, %cst_29 [2] : vector<2x8x32xf32> to vector<2x8xf32>
    %cst_30 = arith.constant dense<0xFF800000> : vector<2xf32>
    %53 = vector.multi_reduction <maximumf>, %52, %cst_30 [1] : vector<2x8xf32> to vector<2xf32>
    %54 = vector.shape_cast %53 : vector<2xf32> to vector<2x1xf32>
    %55 = vector.broadcast %54 : vector<2x1xf32> to vector<2x8xf32>
    %56 = arith.subf %52, %55 : vector<2x8xf32>
    %57 = math.exp %56 : vector<2x8xf32>
    %cst_31 = arith.constant dense<0.000000e+00> : vector<2xf32>
    %58 = vector.multi_reduction <add>, %57, %cst_31 [1] : vector<2x8xf32> to vector<2xf32>
    %59 = vector.shape_cast %58 : vector<2xf32> to vector<2x1xf32>
    %60 = tpu.reciprocal %59 {approx = true} : vector<2x1xf32> -> vector<2x1xf32>
    %61 = vector.broadcast %60 : vector<2x1xf32> to vector<2x8xf32>
    %62 = arith.mulf %57, %61 : vector<2x8xf32>
    %63 = vector.shape_cast %62 : vector<2x8xf32> to vector<2x1x8xf32>
    "tpu.trace_start"() <{level = 10 : i32, message = "nql,nld->nqd"}> : () -> ()
    %cst_32 = arith.constant dense<0.000000e+00> : vector<2x1x32xf32>
    %64 = tpu.matmul %63, %1, %cst_32 {dimension_numbers = #tpu.dot_dimension_numbers<[2], [1], [1], [2], [0, 0, 0, 1, 1, 2], [0], [0]>} : vector<2x1x8xf32>, vector<2x8x32xf32>, vector<2x1x32xf32> -> vector<2x1x32xf32>
    "tpu.trace_stop"() : () -> ()
    %65 = vector.shape_cast %64 : vector<2x1x32xf32> to vector<2x32xf32>
    %c0_33 = arith.constant 0 : index
    %c0_34 = arith.constant 0 : index
    %66 = vector.load %arg12[%c0_33, %c0_34] : memref<32x32xf32, #tpu.memory_space<vmem>>, vector<32x32xf32>
    %cst_35 = arith.constant dense<0.000000e+00> : vector<2x32xf32>
    %67 = tpu.matmul %65, %66, %cst_35 {dimension_numbers = #tpu.dot_dimension_numbers<[1], [0], [0], [1], [0, 0, 1, 1], [], []>} : vector<2x32xf32>, vector<32x32xf32>, vector<2x32xf32> -> vector<2x32xf32>
    %c0_36 = arith.constant 0 : index
    %c0_37 = arith.constant 0 : index
    %68 = vector.load %arg13[%c0_36, %c0_37] : memref<1x32xf32, #tpu.memory_space<vmem>>, vector<1x32xf32>
    %69 = vector.broadcast %68 : vector<1x32xf32> to vector<2x32xf32>
    %70 = arith.addf %67, %69 : vector<2x32xf32>
    %71 = vector.shape_cast %13 : vector<16x32xf32> to vector<2x8x32xf32>
    %72 = vector.shape_cast %70 : vector<2x32xf32> to vector<2x1x32xf32>
    %73 = vector.broadcast %72 : vector<2x1x32xf32> to vector<2x8x32xf32>
    %74 = arith.addf %71, %73 : vector<2x8x32xf32>
    %75 = math.tanh %74 : vector<2x8x32xf32>
    %c0_38 = arith.constant 0 : index
    %c0_39 = arith.constant 0 : index
    %76 = vector.load %arg14[%c0_38, %c0_39] : memref<1x32xf32, #tpu.memory_space<vmem>>, vector<1x32xf32>
    %77 = vector.shape_cast %76 : vector<1x32xf32> to vector<1x1x32xf32>
    %78 = vector.broadcast %77 : vector<1x1x32xf32> to vector<2x8x32xf32>
    %79 = arith.mulf %75, %78 : vector<2x8x32xf32>
    %cst_40 = arith.constant dense<0.000000e+00> : vector<2x8xf32>
    %80 = vector.multi_reduction <add>, %79, %cst_40 [2] : vector<2x8x32xf32> to vector<2x8xf32>
    %cst_41 = arith.constant dense<0xFF800000> : vector<2xf32>
    %81 = vector.multi_reduction <maximumf>, %80, %cst_41 [1] : vector<2x8xf32> to vector<2xf32>
    %82 = vector.shape_cast %81 : vector<2xf32> to vector<2x1xf32>
    %83 = vector.broadcast %82 : vector<2x1xf32> to vector<2x8xf32>
    %84 = arith.subf %80, %83 : vector<2x8xf32>
    %85 = math.exp %84 : vector<2x8xf32>
    %cst_42 = arith.constant dense<0.000000e+00> : vector<2xf32>
    %86 = vector.multi_reduction <add>, %85, %cst_42 [1] : vector<2x8xf32> to vector<2xf32>
    %87 = vector.shape_cast %86 : vector<2xf32> to vector<2x1xf32>
    %88 = tpu.reciprocal %87 {approx = true} : vector<2x1xf32> -> vector<2x1xf32>
    %89 = vector.broadcast %88 : vector<2x1xf32> to vector<2x8xf32>
    %90 = arith.mulf %85, %89 : vector<2x8xf32>
    %91 = vector.shape_cast %90 : vector<2x8xf32> to vector<2x1x8xf32>
    "tpu.trace_start"() <{level = 10 : i32, message = "nql,nld->nqd"}> : () -> ()
    %cst_43 = arith.constant dense<0.000000e+00> : vector<2x1x32xf32>
    %92 = tpu.matmul %91, %0, %cst_43 {dimension_numbers = #tpu.dot_dimension_numbers<[2], [1], [1], [2], [0, 0, 0, 1, 1, 2], [0], [0]>} : vector<2x1x8xf32>, vector<2x8x32xf32>, vector<2x1x32xf32> -> vector<2x1x32xf32>
    "tpu.trace_stop"() : () -> ()
    %93 = vector.shape_cast %92 : vector<2x1x32xf32> to vector<2x32xf32>
    %c0_44 = arith.constant 0 : index
    %c0_45 = arith.constant 0 : index
    %94 = vector.load %arg15[%c0_44, %c0_45] : memref<2x64xf32, #tpu.memory_space<vmem>>, vector<2x32xf32>
    tpu.vector_store %arg15[%c0_44, %c0_45], %93 {strides = array<i32>} : memref<2x64xf32, #tpu.memory_space<vmem>>, vector<2x32xf32>,
    %c0_46 = arith.constant 0 : index
    %c32 = arith.constant 32 : index
    %95 = vector.load %arg15[%c0_46, %c32] : memref<2x64xf32, #tpu.memory_space<vmem>>, vector<2x32xf32>
    tpu.vector_store %arg15[%c0_46, %c32], %65 {strides = array<i32>} : memref<2x64xf32, #tpu.memory_space<vmem>>, vector<2x32xf32>,
    return
  }
  func.func @transform_0(%arg0: i32) -> (i32, i32, i32) {
    %c0_i32 = arith.constant 0 : i32
    %c0_i32_0 = arith.constant 0 : i32
    %c0_i32_1 = arith.constant 0 : i32
    return %arg0, %c0_i32, %c0_i32_0 : i32, i32, i32
  }
  func.func @transform_1(%arg0: i32) -> (i32, i32, i32) {
    %c0_i32 = arith.constant 0 : i32
    %c0_i32_0 = arith.constant 0 : i32
    %c0_i32_1 = arith.constant 0 : i32
    return %arg0, %c0_i32, %c0_i32_0 : i32, i32, i32
  }
  func.func @transform_2(%arg0: i32) -> (i32, i32) {
    %c0_i32 = arith.constant 0 : i32
    %c0_i32_0 = arith.constant 0 : i32
    return %arg0, %c0_i32 : i32, i32
  }
  func.func @transform_3(%arg0: i32) -> (i32, i32) {
    %c0_i32 = arith.constant 0 : i32
    %c0_i32_0 = arith.constant 0 : i32
    %c0_i32_1 = arith.constant 0 : i32
    return %c0_i32, %c0_i32_0 : i32, i32
  }
  func.func @transform_4(%arg0: i32) -> (i32, i32) {
    %c0_i32 = arith.constant 0 : i32
    %c0_i32_0 = arith.constant 0 : i32
    %c0_i32_1 = arith.constant 0 : i32
    return %c0_i32, %c0_i32_0 : i32, i32
  }
  func.func @transform_5(%arg0: i32) -> (i32, i32) {
    %c0_i32 = arith.constant 0 : i32
    %c0_i32_0 = arith.constant 0 : i32
    %c0_i32_1 = arith.constant 0 : i32
    return %c0_i32, %c0_i32_0 : i32, i32
  }
  func.func @transform_6(%arg0: i32) -> (i32, i32) {
    %c0_i32 = arith.constant 0 : i32
    %c0_i32_0 = arith.constant 0 : i32
    %c0_i32_1 = arith.constant 0 : i32
    return %c0_i32, %c0_i32_0 : i32, i32
  }
  func.func @transform_7(%arg0: i32) -> (i32, i32) {
    %c0_i32 = arith.constant 0 : i32
    %c0_i32_0 = arith.constant 0 : i32
    %c0_i32_1 = arith.constant 0 : i32
    return %c0_i32, %c0_i32_0 : i32, i32
  }
  func.func @transform_8(%arg0: i32) -> (i32, i32) {
    %c0_i32 = arith.constant 0 : i32
    %c0_i32_0 = arith.constant 0 : i32
    %c0_i32_1 = arith.constant 0 : i32
    return %c0_i32, %c0_i32_0 : i32, i32
  }
  func.func @transform_9(%arg0: i32) -> (i32, i32) {
    %c0_i32 = arith.constant 0 : i32
    %c0_i32_0 = arith.constant 0 : i32
    %c0_i32_1 = arith.constant 0 : i32
    return %c0_i32, %c0_i32_0 : i32, i32
  }
  func.func @transform_10(%arg0: i32) -> (i32, i32) {
    %c0_i32 = arith.constant 0 : i32
    %c0_i32_0 = arith.constant 0 : i32
    %c0_i32_1 = arith.constant 0 : i32
    return %c0_i32, %c0_i32_0 : i32, i32
  }
  func.func @transform_11(%arg0: i32) -> (i32, i32) {
    %c0_i32 = arith.constant 0 : i32
    %c0_i32_0 = arith.constant 0 : i32
    %c0_i32_1 = arith.constant 0 : i32
    return %c0_i32, %c0_i32_0 : i32, i32
  }
  func.func @transform_12(%arg0: i32) -> (i32, i32) {
    %c0_i32 = arith.constant 0 : i32
    %c0_i32_0 = arith.constant 0 : i32
    %c0_i32_1 = arith.constant 0 : i32
    return %c0_i32, %c0_i32_0 : i32, i32
  }
  func.func @transform_13(%arg0: i32) -> (i32, i32) {
    %c0_i32 = arith.constant 0 : i32
    %c0_i32_0 = arith.constant 0 : i32
    %c0_i32_1 = arith.constant 0 : i32
    return %c0_i32, %c0_i32_0 : i32, i32
  }
  func.func @transform_14(%arg0: i32) -> (i32, i32) {
    %c0_i32 = arith.constant 0 : i32
    %c0_i32_0 = arith.constant 0 : i32
    return %arg0, %c0_i32 : i32, i32
  }
}

</mosaic_0001>

<bundles_post_ra>
// kernel: tpu_custom_call.1
= control target key start
LH: loop header
LB: loop body
LE: loop exit
PB: predicated region body
PF: predicated region fallthrough
CT: control target
= control target key end

     0   :  { %19 = vsyncpa [#allocation3], 0  ;;  %s1986_s0 = inlined_call_operand.hbm [shape: f32[2,8,32], index: 0, kind: input, shape index: {}]   ;;  %s1987_s1 = inlined_call_operand.hbm [shape: f32[2,8,32], index: 1, kind: input, shape index: {}]   ;;  %s1988_s2 = inlined_call_operand.vmem [shape: f32[2,8], index: 2, kind: input, shape index: {}]   ;;  %s1989_s3 = inlined_call_operand.hbm [shape: f32[32,64], index: 3, kind: input, shape index: {}]   ;;  %s1990_s4 = inlined_call_operand.vmem [shape: f32[1,64], index: 4, kind: input, shape index: {}]   ;;  %s1991_s5 = inlined_call_operand.vmem [shape: f32[1,32], index: 5, kind: input, shape index: {}]   ;;  %s1992_s6 = inlined_call_operand.hbm [shape: f32[32,32], index: 6, kind: input, shape index: {}]   ;;  %s1993_s7 = inlined_call_operand.vmem [shape: f32[1,32], index: 7, kind: input, shape index: {}]   ;;  %s1994_s8 = inlined_call_operand.hbm [shape: f32[32,32], index: 8, kind: input, shape index: {}]   ;;  %s1995_s9 = inlined_call_operand.vmem [shape: f32[1,32], index: 9, kind: input, shape index: {}]   ;;  %s1996_s10 = inlined_call_operand.vmem [shape: f32[1,32], index: 10, kind: input, shape index: {}]   ;;  %s1997_s11 = inlined_call_operand.hbm [shape: f32[32,32], index: 11, kind: input, shape index: {}]   ;;  %s1998_s12 = inlined_call_operand.vmem [shape: f32[1,32], index: 12, kind: input, shape index: {}]   ;;  %s1999_s13 = inlined_call_operand.vmem [shape: f32[1,32], index: 13, kind: input, shape index: {}]   ;;  %s2000_s14 = inlined_call_operand.hbm [shape: f32[2,64], index: 14, kind: output, shape index: {}]  }
   0x1   :  { %20 = vsyncpa [#allocation6], 0 }
   0x2   :  { %21 = vsyncpa [#allocation9], 0 }
   0x3   :  { %22 = vsyncpa [#allocation12], 0 }
   0x4   :  { %23 = vsyncpa [#allocation4], 0  ;;  %s1688_s29 = smov [#allocation5]   ;;  %s1689_s15 = smov [#allocation8]  }
   0x5   :  { %s41_s30 = sshll.u32 %s1688_s29, 4  ;;  %s71_s16 = sshll.u32 %s1689_s15, 4  ;;  %s42_s30 = int_to_ptr.vmem [resolvable:$true] %s41_s30  ;;  %s72_s16 = int_to_ptr.vmem [resolvable:$true] %s71_s16 }
   0x6   :  { %s1546_s17 = scalar_lea.vmem %s42_s30, 256  ;;  %p1551_p1 = scmp.lt.s32.totalorder %s42_s30, %s42_s30 }
   0x7   :  { %p1547_p0 = scmp.ne.s32.totalorder %s42_s30, %s1546_s17  ;;  %p1552_p2 = scmp.lt.s32.totalorder %s1546_s17, %s1546_s17 }
   0x9   :  { %p1553_p3 = por %p1552_p2, %p1551_p1 }
   0xb   :  { %p1554_p4 = pnand %p1553_p3, %p1547_p0 }
   0xd   :  { %1557 = shalt.err (!%p1554_p4)
}
   0xe   :  { %s1690_s18 = smov 128   ;;  %s1691_s19 = smov 8  }
   0xf   :  { %47 = dma.hbm_to_vmem [thread:$0]  %s1987_s1, 256, %s42_s30, [#allocation6], %s1690_s18, %s1690_s18, %s1691_s19  }
  0x10   :  { %s1566_s22 = scalar_lea.vmem %s72_s16, 512  ;;  %p1571_p6 = scmp.lt.s32.totalorder %s72_s16, %s72_s16 }
  0x11   :  { %p1567_p5 = scmp.ne.s32.totalorder %s72_s16, %s1566_s22  ;;  %p1572_p7 = scmp.lt.s32.totalorder %s1566_s22, %s1566_s22 }
  0x13   :  { %p1573_p8 = por %p1572_p7, %p1571_p6 }
  0x15   :  { %p1574_p9 = pnand %p1573_p8, %p1567_p5 }
  0x17   :  { %1577 = shalt.err (!%p1574_p9)
}
  0x18   :  { %77 = dma.hbm_to_vmem [thread:$0]  %s1992_s6, 512, %s72_s16, [#allocation9], %s1690_s18, %s1690_s18, %s1691_s19  }
  0x19   :  { %s1692_s25 = smov [#allocation2]   ;;  %s1693_s27 = smov [#allocation7]  }
  0x1a   :  { %s29_s26 = sshll.u32 %s1692_s25, 4  ;;  %s55_s28 = sshll.u32 %s1693_s27, 4  ;;  %s30_s26 = int_to_ptr.vmem [resolvable:$true] %s29_s26  ;;  %s56_s28 = int_to_ptr.vmem [resolvable:$true] %s55_s28 }
  0x1b   :  { %s1586_s1 = scalar_lea.vmem %s30_s26, 256  ;;  %p1591_p11 = scmp.lt.s32.totalorder %s30_s26, %s30_s26 }
  0x1c   :  { %p1587_p10 = scmp.ne.s32.totalorder %s30_s26, %s1586_s1  ;;  %p1592_p12 = scmp.lt.s32.totalorder %s1586_s1, %s1586_s1 }
  0x1e   :  { %p1593_p13 = por %p1592_p12, %p1591_p11 }
  0x20   :  { %p1594_p0 = pnand %p1593_p13, %p1587_p10 }
  0x22   :  { %1597 = shalt.err (!%p1594_p0)
}
  0x23   :  { %35 = dma.hbm_to_vmem [thread:$0]  %s1986_s0, 256, %s30_s26, [#allocation3], %s1690_s18, %s1690_s18, %s1691_s19  }
  0x24   :  { %s1606_s6 = scalar_lea.vmem %s56_s28, 512  ;;  %p1611_p2 = scmp.lt.s32.totalorder %s56_s28, %s56_s28 }
  0x25   :  { %p1607_p1 = scmp.ne.s32.totalorder %s56_s28, %s1606_s6  ;;  %p1612_p3 = scmp.lt.s32.totalorder %s1606_s6, %s1606_s6 }
  0x27   :  { %p1613_p4 = por %p1612_p3, %p1611_p2 }
  0x29   :  { %p1614_p5 = pnand %p1613_p4, %p1607_p1 }
  0x2b   :  { %1617 = shalt.err (!%p1614_p5)
}
  0x2c   :  { %61 = dma.hbm_to_vmem [thread:$0]  %s1989_s3, 512, %s56_s28, [#allocation6], %s1690_s18, %s1690_s18, %s1691_s19  }
  0x2d   :  { %s1694_s17 = smov [#allocation10]   ;;  %s1695_s21 = smov [#allocation11]  }
  0x2e   :  { %s85_s20 = sshll.u32 %s1694_s17, 4  ;;  %s101_s22 = sshll.u32 %s1695_s21, 4  ;;  %s86_s20 = int_to_ptr.vmem [resolvable:$true] %s85_s20  ;;  %s102_s22 = int_to_ptr.vmem [resolvable:$true] %s101_s22 }
  0x2f   :  { %s1626_s0 = scalar_lea.vmem %s86_s20, 512  ;;  %p1631_p7 = scmp.lt.s32.totalorder %s86_s20, %s86_s20 }
  0x30   :  { %p1627_p6 = scmp.ne.s32.totalorder %s86_s20, %s1626_s0  ;;  %p1632_p8 = scmp.lt.s32.totalorder %s1626_s0, %s1626_s0 }
  0x32   :  { %p1633_p9 = por %p1632_p8, %p1631_p7 }
  0x34   :  { %p1634_p10 = pnand %p1633_p9, %p1627_p6 }
  0x36   :  { %1637 = shalt.err (!%p1634_p10)
}
  0x37   :  { %91 = dma.hbm_to_vmem [thread:$0]  %s1994_s8, 512, %s86_s20, [#allocation9], %s1690_s18, %s1690_s18, %s1691_s19  }
  0x38   :  { %s1646_s3 = scalar_lea.vmem %s102_s22, 512  ;;  %p1651_p12 = scmp.lt.s32.totalorder %s102_s22, %s102_s22 }
  0x39   :  { %p1647_p11 = scmp.ne.s32.totalorder %s102_s22, %s1646_s3  ;;  %p1652_p13 = scmp.lt.s32.totalorder %s1646_s3, %s1646_s3 }
  0x3b   :  { %p1653_p0 = por %p1652_p13, %p1651_p12 }
  0x3d   :  { %p1654_p1 = pnand %p1653_p0, %p1647_p11 }
  0x3f   :  { %1657 = shalt.err (!%p1654_p1)
}
  0x40   :  { %107 = dma.hbm_to_vmem [thread:$0]  %s1997_s11, 512, %s102_s22, [#allocation12], %s1690_s18, %s1690_s18, %s1691_s19  }
  0x41   :  { %1678 = dma.done.wait [#allocation3], 256  }
  0x42   :  { %1679 = vsyncadd [#allocation3], 4294967040 }
  0x43   :  { %1680 = dma.done.wait [#allocation6], 768  }
  0x44   :  { %1681 = vsyncadd [#allocation6], 4294966528 }
  0x45   :  { %1682 = dma.done.wait [#allocation9], 1024  }
  0x46   :  { %1683 = vsyncadd [#allocation9], 4294966272 }
  0x47   :  { %1684 = dma.done.wait [#allocation12], 512  }
  0x48   :  { %1685 = vsyncadd [#allocation12], 4294966784  ;;  %vm146_vm0 = vcmask 261120   ;;  %v138_v0 = vld [vmem:[#allocation7 + $0x18] sm:$0xff]  ;;  %v137_v1 = vld [vmem:[#allocation7 + $0x10] sm:$0xff]  ;;  %v247_v18 = vlaneseq  ;;  %vm257_vm1 = vcmask 1041409  }
  0x49   :  { %1417 = vmatprep.subr.mxu0 %v138_v0  ;;  %v1814_v2 = vld [vmem:[#allocation2] sm:$0xff]  ;;  %v136_v3 = vld [vmem:[#allocation7 + $0x8] sm:$0xff]  ;;  %vm260_vm2 = vcmask 58368   ;;  %v1696_v33 = vmov 0   ;;  %v1697_v53 = vmov 0.0   ;;  %vm1698_vm3 = vmmov 0  }
  0x4a   :  { %1418 = vmatpush3.msra.mxu0 %v138_v0  ;;  %1425 = vmatprep.mubr.msk.f32.mxu0 %vm146_vm0, %v1814_v2  ;;  %v135_v4 = vld [vmem:[#allocation7] sm:$0xff]  ;;  %v1818_v5 = vld [vmem:[#allocation2 + $0x8] sm:$0xff]  ;;  %v1836_v19 = vshrl.u32 %v247_v18, 7  ;;  %v248_v23 = vand.u32 127, %v247_v18  ;;  %vm343_vm4 = vcmask 64512   ;;  %v591_v0 = vld [vmem:[#allocation10 + $0x18] sm:$0xff] }
  0x4b   :  { %1419 = vmatprep.subr.mxu0 %v137_v1  ;;  %v1364_v6 = vld [vmem:[%s1990_s4] ss:$0 sm:$0xff]  ;;  %1506 = vset.pattern.permute.xlu1 %v1696_v33  ;;  %s1700_s30 = smov 32   ;;  %s1701_s15 = smov 96   ;;  %vm1339_vm5 = vcmask 254976   ;;  %vm1344_vm6 = vcmask 517376  }
  0x4c   :  { %1420 = vmatpush3.msra.mxu0 %v137_v1  ;;  %v1367_v13 = vld [vmem:[%s1991_s5] ss:$0 sm:$0xff]  ;;  %v1839_v20 = vsub.s32 1, %v1836_v19  ;;  %v1846_v25 = vsub.s32 %v248_v23, %v1836_v19  ;;  %v1853_v31 = vsub.s32 0, %v1836_v19  ;;  %1507 = vset.pattern.permute.xlu0 %v1696_v33  ;;  %v590_v1 = vld [vmem:[#allocation10 + $0x10] sm:$0xff] }
  0x4d   :  { %1421 = vmatprep.subr.mxu0 %v136_v3  ;;  %v134_v21 = vld [vmem:[%s1988_s2] sm:$0x3]  ;;  %1428 = vmatprep.subr.mxu1 %v1697_v53 }
  0x4e   :  { %1422 = vmatpush3.msra.mxu0 %v136_v3  ;;  %v292_v22 = vrot.slane %v134_v21, %v1839_v20  ;;  %v285_v32 = vrot.slane %v134_v21, %v1853_v31  ;;  %1429 = vmatpush3.msra.mxu1 %v1814_v2  ;;  %v499_v3 = vld [vmem:[#allocation8 + $0x18] sm:$0xff]  ;;  %v1370_v33 = vld [vmem:[%s1993_s7] ss:$0 sm:$0xff] }
  0x4f   :  { %1423 = vmatprep.subr.mxu0 %v135_v4  ;;  %1433 = vmatprep.subr.mxu1 %v1697_v53 }
  0x50   :  { %1424 = vmatpush3.msra.mxu0 %v135_v4  ;;  %1430 = vmatprep.mubr.msk.f32.mxu1 %vm1698_vm3, %v1697_v53  ;;  %v589_v4 = vld [vmem:[#allocation10 + $0x8] sm:$0xff] }
  0x51   :  { %1426 = vmatmul.mubr.msk.f32.vlgmr.msra.gmra.mxu0 %vm146_vm0, %v1818_v5  ;;  %1449 = vmatprep.subr.mxu0 %v1697_v53 }
  0x52   :  { %1457 = vmatprep.mubr.msk.f32.mxu0 %vm1698_vm3, %v1697_v53  ;;  %1450 = vmatpush3.msra.mxu0 %v591_v0 }
  0x53   :  { %1451 = vmatprep.subr.mxu0 %v1697_v53 }
  0x54   :  { %1452 = vmatpush3.msra.mxu0 %v590_v1 }
  0x55   :  { %1453 = vmatprep.subr.mxu0 %v1697_v53 }
  0x56   :  { %1454 = vmatpush3.msra.mxu0 %v589_v4 }
  0x57   :  { %1455 = vmatprep.subr.mxu0 %v1697_v53 }
 0x111   :  { %v1427_v7 = vpop.f32.mrf.mxu0 }
 0x112   :  { %v1825_v8 = vadd.f32 %v1427_v7, %v1364_v6  ;;  %v588_v7 = vld [vmem:[#allocation10] sm:$0xff] }
 0x113   :  { %v219_v9 = vpop.f32.mrf.mxu0  ;;  %1456 = vmatpush3.msra.mxu0 %v588_v7 }
 0x114   :  { %v1827_v10 = vadd.f32 %v1364_v6, %v219_v9  ;;  %1508 = vtanh.f32 %v1825_v8  ;;  %v498_v6 = vld [vmem:[#allocation8 + $0x10] sm:$0xff]  ;;  %v497_v9 = vld [vmem:[#allocation8 + $0x8] sm:$0xff]  ;;  %1465 = vmatprep.subr.mxu0 %v1697_v53 }
 0x116   :  { %1510 = vtanh.f32 %v1827_v10 }
 0x121   :  { %v1509_v11 = vpop.eup %1508 }
 0x122   :  { %v238_v16 = vmul.f32 %v1509_v11, %v1367_v13  ;;  %v496_v11 = vld [vmem:[#allocation8] sm:$0xff] }
 0x123   :  { %v1511_v12 = vpop.eup %1510 }
 0x124   :  { %v237_v14 = vmul.f32 %v1511_v12, %v1367_v13  ;;  %v242_v17 = vsel %vm146_vm0, %v238_v16, 0.0  ;;  %v132_v12 = vld [vmem:[#allocation5] sm:$0xff]  ;;  %v133_v13 = vld [vmem:[#allocation5 + $0x8] sm:$0xff] }
 0x126   :  { %v239_v15 = vsel %vm146_vm0, %v237_v14, 0.0 }
 0x127   :  { %240 = vadd.xlane.f32.xlu0 %v239_v15 }
 0x12b   :  { %243 = vadd.xlane.f32.xlu0 %v242_v17 }
 0x141   :  { %294 = vbcast.lane.b32.xlu0 %v292_v22, 256  ;;  %v1699_v22 = vmov 1966171168  }
 0x142   :  { %v677_v23 = vunpack.c.l.s4 %v1699_v22 }
 0x1b0   :  { %v241_v24 = vpop.xlane.xlu0 %240 }
 0x1b1   :  { %v252_v27 = vrot.slane %v241_v24, %v1846_v25 }
 0x1b4   :  { %v244_v26 = vpop.xlane.xlu0 %243 }
 0x1b5   :  { %v256_v28 = vrot.slane %v244_v26, %v1846_v25 }
 0x1b7   :  { %v258_v29 = vsel %vm257_vm1, %v256_v28, %v252_v27 }
 0x1b8   :  { %v261_v30 = vsel %vm260_vm2, %v258_v29, -inf  ;;  %v295_v45 = vpop.permute.xlu0 %294 }
 0x1b9   :  { %262 = vmax.xlane.f32.xlu1 %v261_v30 }
 0x1ca   :  { %287 = vbcast.lane.b32.xlu1 %v285_v32, 256 }
 0x242   :  { %v263_v34 = vpop.xlane.xlu1 %262 }
 0x243   :  { %v268_v35 = vrot.slane %v263_v34, %v1853_v31  ;;  %v272_v36 = vrot.slane %v263_v34, %v1839_v20 }
 0x245   :  { %v275_v37 = vsub.f32 %v241_v24, %v268_v35  ;;  %v276_v38 = vsub.f32 %v244_v26, %v272_v36  ;;  %v678_v24 = vunpack.c.0.s8 %v677_v23  ;;  %v1373_v26 = vld [vmem:[%s1995_s9] ss:$0 sm:$0xff] }
 0x246   :  { %v288_v41 = vpop.permute.xlu1 %287 }
 0x247   :  { %v277_v39 = vmul.f32 1.442695, %v275_v37  ;;  %v279_v40 = vmul.f32 1.442695, %v276_v38  ;;  %v1898_v28 = vsub.s32 %v678_v24, %v1836_v19 }
 0x249   :  { %1512 = vpow2.f32 %v277_v39 }
 0x24a   :  { %1514 = vpow2.f32 %v279_v40 }
 0x256   :  { %v1513_v42 = vpop.eup %1512 }
 0x257   :  { %v298_v43 = vmul.f32 %v1513_v42, %v288_v41  ;;  %v1515_v44 = vpop.eup %1514 }
 0x258   :  { %v299_v46 = vmul.f32 %v1515_v44, %v295_v45  ;;  %v1375_v44 = vld [vmem:[%s1996_s10] ss:$0 sm:$0xff] }
 0x259   :  { %303 = vperm.xlu1 %1506, %v298_v43  }
 0x25d   :  { %306 = vperm.xlu1 %1506, %v299_v46  }
 0x2d4   :  { %v304_v47 = vpop.permute.xlu1 %303 }
 0x2d5   :  { %v311_v49 = vrot.slane %v304_v47, %v1846_v25 }
 0x2d8   :  { %v307_v48 = vpop.permute.xlu1 %306 }
 0x2d9   :  { %v315_v50 = vrot.slane %v307_v48, %v1846_v25 }
 0x2db   :  { %v316_v51 = vsel %vm257_vm1, %v315_v50, %v311_v49 }
 0x2dc   :  { %v318_v52 = vsel %vm260_vm2, %v316_v51, 0.0 }
 0x2dd   :  { %319 = vadd.xlane.f32.xlu1 %v318_v52 }
 0x366   :  { %v320_v54 = vpop.xlane.xlu1 %319 }
 0x367   :  { %1516 = vrcp.f32 %v320_v54 }
 0x374   :  { %v1517_v55 = vpop.eup %1516 }
 0x375   :  { %v326_v56 = vrot.slane %v1517_v55, %v1853_v31  ;;  %v330_v58 = vrot.slane %v1517_v55, %v1839_v20 }
 0x377   :  { %v333_v57 = vmul.f32 %v326_v56, %v298_v43  ;;  %v334_v59 = vmul.f32 %v330_v58, %v299_v46 }
 0x379   :  { %337 = vperm.xlu0 %1507, %v333_v57  }
 0x37d   :  { %418 = vperm.xlu0 %1507, %v334_v59  }
 0x3f4   :  { %v338_v60 = vpop.permute.xlu0 %337 }
 0x3f5   :  { %v342_v61 = vrot.slane %v338_v60, %v1846_v25 }
 0x3f7   :  { %1431 = vmatmul.mubr.msk.f32.vlgmr.msra.gmra.mxu1 %vm343_vm4, %v342_v61 }
 0x3f8   :  { %1434 = vmatpush3.msra.mxu1 %v1818_v5  ;;  %v419_v62 = vpop.permute.xlu0 %418  ;;  %1435 = vmatprep.mubr.msk.f32.mxu1 %vm1698_vm3, %v1697_v53 }
 0x3f9   :  { %v423_v63 = vrot.slane %v419_v62, %v1846_v25  ;;  %1438 = vmatprep.subr.mxu1 %v499_v3 }
 0x3fb   :  { %1436 = vmatmul.mubr.msk.f32.vlgmr.msra.gmra.mxu1 %vm343_vm4, %v423_v63 }
 0x3fc   :  { %1439 = vmatpush3.msra.mxu1 %v499_v3  ;;  %1446 = vmatprep.mubr.msk.f32.mxu1 %vm146_vm0, %v132_v12 }
 0x3fd   :  { %1440 = vmatprep.subr.mxu1 %v498_v6 }
 0x3fe   :  { %1441 = vmatpush3.msra.mxu1 %v498_v6 }
 0x3ff   :  { %1442 = vmatprep.subr.mxu1 %v497_v9 }
 0x400   :  { %1443 = vmatpush3.msra.mxu1 %v497_v9 }
 0x401   :  { %1444 = vmatprep.subr.mxu1 %v496_v11 }
 0x402   :  { %1445 = vmatpush3.msra.mxu1 %v496_v11 }
 0x403   :  { %1447 = vmatmul.mubr.msk.f32.vlgmr.msra.gmra.mxu1 %vm146_vm0, %v133_v13  ;;  %1460 = vmatprep.subr.mxu1 %v1697_v53 }
 0x404   :  { %1461 = vmatpush3.msra.mxu1 %v132_v12  ;;  %1462 = vmatprep.mubr.msk.f32.mxu1 %vm1698_vm3, %v1697_v53 }
 0x405   :  { %1470 = vmatprep.subr.mxu1 %v1697_v53 }
 0x4b7   :  { %v412_v14 = vpop.f32.mrf.mxu1 }
 0x4b9   :  { %v1432_v15 = vpop.f32.mrf.mxu1 }
 0x4bb   :  { %v492_v16 = vpop.f32.mrf.mxu1 }
 0x4bc   :  { %v601_v17 = vrot.slane %v492_v16, 7 }
 0x4bd   :  { %v1437_v18 = vpop.f32.mrf.mxu1 }
 0x4be   :  { %v602_v21 = vsel %vm257_vm1, %v601_v17, %v412_v14 }
 0x4bf   :  { %1458 = vmatmul.mubr.msk.f32.vlgmr.msra.gmra.mxu0 %vm146_vm0, %v602_v21 }
 0x4c0   :  { %1466 = vmatpush3.msra.mxu0 %v133_v13  ;;  %1467 = vmatprep.mubr.msk.f32.mxu0 %vm1698_vm3, %v1697_v53 }
 0x4c1   :  { %1481 = vmatprep.subr.mxu0 %v1697_v53 }
 0x4c3   :  { %v1448_v27 = vpop.f32.mrf.mxu1 }
 0x4c4   :  { %v585_v19 = vadd.f32 %v1448_v27, %v1370_v33  ;;  %v956_v27 = vld [vmem:[#allocation11 + $0x10] sm:$0xff] }
 0x4c5   :  { %v579_v34 = vpop.f32.mrf.mxu1 }
 0x4c6   :  { %v580_v38 = vadd.f32 %v1370_v33, %v579_v34 }
 0x57f   :  { %v671_v29 = vpop.f32.mrf.mxu0 }
 0x580   :  { %v672_v30 = vadd.f32 %v1373_v26, %v671_v29  ;;  %v957_v26 = vld [vmem:[#allocation11 + $0x18] sm:$0xff]  ;;  %v954_v29 = vld [vmem:[#allocation11] sm:$0xff] }
 0x581   :  { %v1459_v32 = vpop.f32.mrf.mxu0 }
 0x582   :  { %v682_v35 = vrot.slane %v672_v30, %v1898_v28 }
 0x584   :  { %v683_v36 = vcombine.high %v682_v35, %v682_v35  ;;  %v690_v37 = vrot.slane %v682_v35, %v1898_v28 }
 0x586   :  { %v697_v39 = vrot.slane %v683_v36, %v1898_v28  ;;  %v701_v40 = vrot.slane %v690_v37, %v1853_v31  ;;  %v1378_v37 = vld [vmem:[%s1998_s12] ss:$0 sm:$0xff] }
 0x588   :  { %v705_v41 = vrot.slane %v697_v39, %v1853_v31  ;;  %v708_v42 = vadd.f32 %v701_v40, %v580_v38 }
 0x58a   :  { %v709_v43 = vadd.f32 %v705_v41, %v585_v19  ;;  %1518 = vtanh.f32 %v708_v42 }
 0x58c   :  { %1520 = vtanh.f32 %v709_v43 }
 0x597   :  { %v1519_v45 = vpop.eup %1518 }
 0x598   :  { %v719_v46 = vmul.f32 %v1519_v45, %v1375_v44 }
 0x599   :  { %v1521_v47 = vpop.eup %1520 }
 0x59a   :  { %v721_v48 = vsel %vm146_vm0, %v719_v46, 0.0  ;;  %v720_v49 = vmul.f32 %v1521_v47, %v1375_v44  ;;  %v1380_v46 = vld [vmem:[%s1999_s13] ss:$0 sm:$0xff]  ;;  %s1702_s13 = smov [#allocation13]  }
 0x59b   :  { %722 = vadd.xlane.f32.xlu0 %v721_v48  ;;  %s1352_s16 = sshll.u32 %s1702_s13, 4  ;;  %s1353_s16 = int_to_ptr.vmem [resolvable:$true] %s1352_s16 }
 0x59c   :  { %v724_v50 = vsel %vm146_vm0, %v720_v49, 0.0  ;;  %s1658_s17 = scalar_lea.vmem %s1353_s16, 32  ;;  %p1663_p3 = scmp.lt.s32.totalorder %s1353_s16, %s1353_s16 }
 0x59d   :  { %725 = vadd.xlane.f32.xlu1 %v724_v50  ;;  %p1659_p2 = scmp.ne.s32.totalorder %s1353_s16, %s1658_s17  ;;  %p1664_p4 = scmp.lt.s32.totalorder %s1658_s17, %s1658_s17 }
 0x59f   :  { %p1665_p5 = por %p1664_p4, %p1663_p3 }
 0x5a1   :  { %p1666_p6 = pnand %p1665_p5, %p1659_p2 }
 0x624   :  { %v723_v51 = vpop.xlane.xlu0 %722 }
 0x625   :  { %v732_v54 = vrot.slane %v723_v51, %v1846_v25 }
 0x626   :  { %v726_v52 = vpop.xlane.xlu1 %725 }
 0x627   :  { %v736_v55 = vrot.slane %v726_v52, %v1846_v25 }
 0x629   :  { %v737_v56 = vsel %vm257_vm1, %v736_v55, %v732_v54 }
 0x62a   :  { %v739_v57 = vsel %vm260_vm2, %v737_v56, -inf }
 0x62b   :  { %740 = vmax.xlane.f32.xlu1 %v739_v57 }
 0x6b4   :  { %v741_v58 = vpop.xlane.xlu1 %740 }
 0x6b5   :  { %v746_v59 = vrot.slane %v741_v58, %v1853_v31  ;;  %v750_v60 = vrot.slane %v741_v58, %v1839_v20 }
 0x6b7   :  { %v753_v61 = vsub.f32 %v723_v51, %v746_v59  ;;  %v754_v62 = vsub.f32 %v726_v52, %v750_v60 }
 0x6b9   :  { %v755_v63 = vmul.f32 1.442695, %v753_v61  ;;  %v757_v0 = vmul.f32 1.442695, %v754_v62 }
 0x6bb   :  { %1522 = vpow2.f32 %v755_v63 }
 0x6bc   :  { %1524 = vpow2.f32 %v757_v0 }
 0x6c8   :  { %v1523_v1 = vpop.eup %1522 }
 0x6c9   :  { %v1525_v3 = vpop.eup %1524  ;;  %762 = vperm.xlu0 %1507, %v1523_v1  }
 0x6ca   :  { %765 = vperm.xlu1 %1506, %v1525_v3  }
 0x744   :  { %v763_v4 = vpop.permute.xlu0 %762 }
 0x745   :  { %v766_v6 = vpop.permute.xlu1 %765  ;;  %v770_v7 = vrot.slane %v763_v4, %v1846_v25 }
 0x746   :  { %v774_v9 = vrot.slane %v766_v6, %v1846_v25 }
 0x748   :  { %v775_v11 = vsel %vm257_vm1, %v774_v9, %v770_v7 }
 0x749   :  { %v777_v12 = vsel %vm260_vm2, %v775_v11, 0.0 }
 0x74a   :  { %778 = vadd.xlane.f32.xlu1 %v777_v12 }
 0x7d3   :  { %v779_v13 = vpop.xlane.xlu1 %778 }
 0x7d4   :  { %1526 = vrcp.f32 %v779_v13 }
 0x7e1   :  { %v1527_v14 = vpop.eup %1526 }
 0x7e2   :  { %v789_v15 = vrot.slane %v1527_v14, %v1839_v20  ;;  %v785_v17 = vrot.slane %v1527_v14, %v1853_v31 }
 0x7e4   :  { %v793_v16 = vmul.f32 %v1525_v3, %v789_v15  ;;  %v792_v18 = vmul.f32 %v1523_v1, %v785_v17 }
 0x7e6   :  { %876 = vperm.xlu0 %1507, %v793_v16  }
 0x7ea   :  { %796 = vperm.xlu0 %1507, %v792_v18  }
 0x861   :  { %v877_v21 = vpop.permute.xlu0 %876 }
 0x862   :  { %v881_v22 = vrot.slane %v877_v21, %v1846_v25 }
 0x864   :  { %1468 = vmatmul.mubr.msk.f32.vlgmr.msra.gmra.mxu0 %vm343_vm4, %v881_v22 }
 0x865   :  { %v797_v23 = vpop.permute.xlu0 %796  ;;  %1482 = vmatpush3.msra.mxu0 %v1814_v2  ;;  %1483 = vmatprep.mubr.msk.f32.mxu0 %vm1698_vm3, %v1697_v53  ;;  %v955_v2 = vld [vmem:[#allocation11 + $0x8] sm:$0xff] }
 0x866   :  { %v801_v24 = vrot.slane %v797_v23, %v1846_v25  ;;  %1486 = vmatprep.subr.mxu0 %v1697_v53 }
 0x868   :  { %1463 = vmatmul.mubr.msk.f32.vlgmr.msra.gmra.mxu1 %vm343_vm4, %v801_v24 }
 0x869   :  { %1471 = vmatpush3.msra.mxu1 %v957_v26  ;;  %1478 = vmatprep.mubr.msk.f32.mxu1 %vm1698_vm3, %v1697_v53 }
 0x86a   :  { %1472 = vmatprep.subr.mxu1 %v1697_v53 }
 0x86b   :  { %1473 = vmatpush3.msra.mxu1 %v956_v27 }
 0x86c   :  { %1474 = vmatprep.subr.mxu1 %v1697_v53 }
 0x86d   :  { %1475 = vmatpush3.msra.mxu1 %v955_v2 }
 0x86e   :  { %1476 = vmatprep.subr.mxu1 %v1697_v53 }
 0x86f   :  { %1477 = vmatpush3.msra.mxu1 %v954_v29 }
 0x924   :  { %v950_v30 = vpop.f32.mrf.mxu0 }
 0x925   :  { %v967_v33 = vrot.slane %v950_v30, 7 }
 0x926   :  { %v1469_v32 = vpop.f32.mrf.mxu0 }
 0x928   :  { %v870_v34 = vpop.f32.mrf.mxu1 }
 0x929   :  { %v1939_v35 = vsel %vm257_vm1, %v967_v33, %v870_v34 }
 0x92a   :  { %v1464_v36 = vpop.f32.mrf.mxu1  ;;  %1479 = vmatmul.mubr.msk.f32.vlgmr.msra.gmra.mxu1 %vm146_vm0, %v1939_v35 }
 0x9ea   :  { %v1037_v38 = vpop.f32.mrf.mxu1 }
 0x9eb   :  { %v1038_v39 = vadd.f32 %v1378_v37, %v1037_v38 }
 0x9ec   :  { %v1480_v40 = vpop.f32.mrf.mxu1 }
 0x9ed   :  { %v1048_v19 = vrot.slane %v1038_v39, %v1898_v28 }
 0x9ef   :  { %v1049_v41 = vcombine.high %v1048_v19, %v1048_v19  ;;  %v1056_v42 = vrot.slane %v1048_v19, %v1898_v28 }
 0x9f1   :  { %v1067_v43 = vrot.slane %v1056_v42, %v1853_v31  ;;  %v1063_v44 = vrot.slane %v1049_v41, %v1898_v28 }
 0x9f3   :  { %1072 = vrot.lane.b32.xlu0 %v1067_v43, %s1700_s30  ;;  %v1071_v45 = vrot.slane %v1063_v44, %v1853_v31 }
 0x9f7   :  { %1074 = vrot.lane.b32.xlu0 %v1071_v45, %s1700_s30 }
 0x9fb   :  { %1088 = vrot.lane.b32.xlu0 %v1380_v46, %s1700_s30 }
 0xa65   :  { %v1073_v47 = vpop.permute.xlu0 %1072 }
 0xa66   :  { %v1078_v48 = vadd.f32 %v1073_v47, %v1827_v10 }
 0xa68   :  { %1528 = vtanh.f32 %v1078_v48 }
 0xa69   :  { %v1075_v49 = vpop.permute.xlu0 %1074 }
 0xa6a   :  { %v1079_v28 = vadd.f32 %v1075_v49, %v1825_v8 }
 0xa6c   :  { %1530 = vtanh.f32 %v1079_v28 }
 0xa6d   :  { %v1089_v50 = vpop.permute.xlu0 %1088 }
 0xa75   :  { %v1529_v51 = vpop.eup %1528 }
 0xa76   :  { %v1091_v52 = vmul.f32 %v1529_v51, %v1089_v50 }
 0xa78   :  { %1095 = vrot.lane.b32.xlu0 %v1091_v52, %s1701_s15 }
 0xa79   :  { %v1531_v54 = vpop.eup %1530 }
 0xa7a   :  { %v1092_v55 = vmul.f32 %v1531_v54, %v1089_v50 }
 0xa7c   :  { %1097 = vrot.lane.b32.xlu0 %v1092_v55, %s1701_s15 }
 0xaea   :  { %v1096_v56 = vpop.permute.xlu0 %1095 }
 0xaeb   :  { %v1101_v57 = vsel %vm146_vm0, %v1096_v56, 0.0 }
 0xaec   :  { %1102 = vadd.xlane.f32.xlu0 %v1101_v57 }
 0xaee   :  { %v1098_v58 = vpop.permute.xlu0 %1097 }
 0xaef   :  { %v1104_v10 = vsel %vm146_vm0, %v1098_v58, 0.0 }
 0xaf0   :  { %1105 = vadd.xlane.f32.xlu1 %v1104_v10 }
 0xb75   :  { %v1103_v59 = vpop.xlane.xlu0 %1102 }
 0xb76   :  { %v1112_v8 = vrot.slane %v1103_v59, %v1846_v25 }
 0xb79   :  { %v1106_v60 = vpop.xlane.xlu1 %1105 }
 0xb7a   :  { %v1116_v61 = vrot.slane %v1106_v60, %v1846_v25 }
 0xb7c   :  { %v1117_v62 = vsel %vm257_vm1, %v1116_v61, %v1112_v8 }
 0xb7d   :  { %v1119_v63 = vsel %vm260_vm2, %v1117_v62, -inf }
 0xb7e   :  { %1120 = vmax.xlane.f32.xlu1 %v1119_v63 }
 0xc07   :  { %v1121_v0 = vpop.xlane.xlu1 %1120 }
 0xc08   :  { %v1126_v1 = vrot.slane %v1121_v0, %v1853_v31  ;;  %v1130_v3 = vrot.slane %v1121_v0, %v1839_v20 }
 0xc0a   :  { %v1133_v4 = vsub.f32 %v1103_v59, %v1126_v1  ;;  %v1134_v6 = vsub.f32 %v1106_v60, %v1130_v3 }
 0xc0c   :  { %v1135_v7 = vmul.f32 1.442695, %v1133_v4  ;;  %v1137_v9 = vmul.f32 1.442695, %v1134_v6 }
 0xc0e   :  { %1532 = vpow2.f32 %v1135_v7 }
 0xc0f   :  { %1534 = vpow2.f32 %v1137_v9 }
 0xc1b   :  { %v1533_v11 = vpop.eup %1532 }
 0xc1c   :  { %1142 = vperm.xlu1 %1506, %v1533_v11   ;;  %v1535_v12 = vpop.eup %1534 }
 0xc20   :  { %1145 = vperm.xlu1 %1506, %v1535_v12  }
 0xc97   :  { %v1143_v13 = vpop.permute.xlu1 %1142 }
 0xc98   :  { %v1150_v15 = vrot.slane %v1143_v13, %v1846_v25 }
 0xc9b   :  { %v1146_v14 = vpop.permute.xlu1 %1145 }
 0xc9c   :  { %v1154_v16 = vrot.slane %v1146_v14, %v1846_v25 }
 0xc9e   :  { %v1155_v17 = vsel %vm257_vm1, %v1154_v16, %v1150_v15 }
 0xc9f   :  { %v1157_v18 = vsel %vm260_vm2, %v1155_v17, 0.0 }
 0xca0   :  { %1158 = vadd.xlane.f32.xlu0 %v1157_v18 }
 0xd29   :  { %v1159_v21 = vpop.xlane.xlu0 %1158 }
 0xd2a   :  { %1536 = vrcp.f32 %v1159_v21 }
 0xd37   :  { %v1537_v22 = vpop.eup %1536 }
 0xd38   :  { %v1169_v23 = vrot.slane %v1537_v22, %v1839_v20  ;;  %v1165_v24 = vrot.slane %v1537_v22, %v1853_v31 }
 0xd3a   :  { %v1173_v26 = vmul.f32 %v1535_v12, %v1169_v23  ;;  %v1172_v27 = vmul.f32 %v1533_v11, %v1165_v24 }
 0xd3c   :  { %1256 = vperm.xlu0 %1507, %v1173_v26   ;;  %1176 = vperm.xlu1 %1506, %v1172_v27  }
 0xd40   :  { %1341 = vrot.lane.b32.xlu1 %v1939_v35, %s1700_s30 }
 0xdb7   :  { %v1177_v2 = vpop.permute.xlu1 %1176  ;;  %v1257_v30 = vpop.permute.xlu0 %1256 }
 0xdb8   :  { %v1181_v29 = vrot.slane %v1177_v2, %v1846_v25  ;;  %v1261_v20 = vrot.slane %v1257_v30, %v1846_v25 }
 0xdba   :  { %1484 = vmatmul.mubr.msk.f32.vlgmr.msra.gmra.mxu0 %vm343_vm4, %v1181_v29 }
 0xdbb   :  { %1487 = vmatpush3.msra.mxu0 %v1818_v5  ;;  %1488 = vmatprep.mubr.msk.f32.mxu0 %vm1698_vm3, %v1697_v53  ;;  %v1342_v5 = vpop.permute.xlu1 %1341 }
 0xdbe   :  { %1489 = vmatmul.mubr.msk.f32.vlgmr.msra.gmra.mxu0 %vm343_vm4, %v1261_v20 }
 0xe7a   :  { %v1250_v31 = vpop.f32.mrf.mxu0 }
 0xe7c   :  { %v1485_v32 = vpop.f32.mrf.mxu0 }
 0xe7e   :  { %v1330_v33 = vpop.f32.mrf.mxu0 }
 0xe7f   :  { %v1336_v34 = vrot.slane %v1330_v33, 7 }
 0xe80   :  { %v1490_v35 = vpop.f32.mrf.mxu0 }
 0xe81   :  { %v1337_v36 = vsel %vm257_vm1, %v1336_v34, %v1250_v31 }
 0xe82   :  { %1340 = vst.msk [vmem:[#allocation13] sm:$0x3] %vm1339_vm5, %v1337_v36 }
 0xe83   :  { %1345 = vst.msk [vmem:[#allocation13] sm:$0x3] %vm1344_vm6, %v1342_v5 }
 0xe84   :  { %1669 = shalt.err (!%p1666_p6)
}
 0xe85   :  { %1355 = dma.vmem_to_hbm [thread:$0]  %s1353_s16, 32, %s2000_s14, [#allocation4]  }
 0xe86   :  { %1686 = dma.done.wait [#allocation4], 32  }
 0xe87   :  { %1687 = vsyncadd [#allocation4], 4294967264 }
 0xe88   :  { %1359 = vsyncpa [#allocation3], 1 }
 0xe89   :  { %1360 = vsyncpa [#allocation6], 1 }
 0xe8a   :  { %1361 = vsyncpa [#allocation9], 1 }
 0xe8b   :  { %1362 = vsyncpa [#allocation12], 1 }
 0xe8c   :  { %1363 = vsyncpa [#allocation4], 1 }

</bundles_post_ra>
